<compile_context>
chip_gen: v6e
topology: v6e:2x2x1
jax: 0.10.0
libtpu: 0.0.40
codegen_flags: <defaults>
</compile_context>

<pallas_src>
import functools
import math

import jax
import jax.numpy as jnp
from jax.experimental import pallas as pl
from jax.experimental.pallas import tpu as pltpu

LANE = 128        # lane width: final-layer N padded to this for lane-dense stores
SUBLANE = 8       # f32 sublane quantum: intermediate N / next-layer K alignment
MAX_TILE_B = 512  # cap on the batch tile (near HBM roofline already at 512 rows)


def _round_up(x, m):
    return (x + m - 1) // m * m


def _pick_tile_b(batch):
    """Largest batch tile (<= MAX_TILE_B) that still leaves >= 2 grid steps so
    v7x's two TensorCores can split the 'parallel' batch axis; tiny batches
    just take everything in one step."""
    if batch <= 2 * SUBLANE:
        return batch  # single step; block dim == full array dim (always legal)
    half = _round_up(-(-batch // 2), SUBLANE)
    return max(SUBLANE, min(MAX_TILE_B, half))


# ----------------------------------------------------------------------------
# Fused MLP kernel — one batch tile per grid step, all layers in one body.
#   refs = (x_ref, w1_ref, b1_ref, ..., wL_ref, bL_ref, o_ref)
#   x_ref : [TILE_B, d_in]      VMEM (streamed, double-buffered)
#   wl_ref: [K_l, N_l]          VMEM (pre-transposed [in, out], VMEM-resident)
#   bl_ref: [1, N_l]            VMEM
#   o_ref : [TILE_B, N_last_p]  VMEM (lane-dense 128-wide store)
# Intermediate activations live only in vregs/VMEM (never HBM).
# ----------------------------------------------------------------------------
def _mlp_fused_kernel(*refs, num_layers):
    x_ref, o_ref = refs[0], refs[-1]
    wb_refs = refs[1:-1]
    h = x_ref[...]
    for l in range(num_layers):
        w = wb_refs[2 * l][...]
        b = wb_refs[2 * l + 1][...]
        # [TB, K] @ [K, N] on the MXU with f32 accumulation; weights were
        # stored [in, out] at prepare time so no in-kernel transpose.
        h = jnp.dot(h, w, preferred_element_type=jnp.float32) + b
        if l < num_layers - 1:
            h = jnp.maximum(h, 0.0)          # ReLU on all but the last layer
    o_ref[...] = h.astype(o_ref.dtype)


# ----------------------------------------------------------------------------
# Parameter init matching Net_He.__init__ exactly (PyTorch [out, in] layout):
#   weight: kaiming_uniform_(nonlinearity='relu') -> U(+/- sqrt(6/fan_in))
#   bias  : nn.Linear default                     -> U(+/- 1/sqrt(fan_in))
# ----------------------------------------------------------------------------
def init_net_he(key, layers):
    params = []
    for in_sz, out_sz in zip(layers, layers[1:]):
        key, kw, kb = jax.random.split(key, 3)
        w_bound = math.sqrt(6.0 / in_sz)
        w = jax.random.uniform(kw, (out_sz, in_sz), jnp.float32,
                               minval=-w_bound, maxval=w_bound)
        b_bound = 1.0 / math.sqrt(in_sz)
        b = jax.random.uniform(kb, (out_sz,), jnp.float32,
                               minval=-b_bound, maxval=b_bound)
        params.append((w, b))
    return params


def prepare_params(params):
    """One-time prep: transpose PyTorch [out, in] weights to [in, out].  Pad
    only the output (N) dims with zeros: intermediate layers to a multiple of
    8 (next layer's K stays sublane-aligned), the final layer to 128 so the
    HBM store is lane-dense.  K dims stay at their natural size."""
    prepared = []
    num_layers = len(params)
    k = params[0][0].shape[1]              # d_in of the first layer, un-padded
    for l, (w, b) in enumerate(params):
        out_sz, in_sz = w.shape
        n_pad = _round_up(out_sz, LANE if l == num_layers - 1 else SUBLANE)
        wp = jnp.zeros((k, n_pad), jnp.float32).at[:in_sz, :out_sz].set(w.T)
        bp = jnp.zeros((1, n_pad), jnp.float32).at[0, :out_sz].set(b)
        prepared.append((wp, bp))
        k = n_pad                          # next layer's K matches this padded N
    return prepared


def _net_he_forward_impl(prepared, x, *, d_out, single_buffer_weights):
    num_layers = len(prepared)
    B, d_in = x.shape
    assert prepared[0][0].shape[0] == d_in
    n_last_p = prepared[-1][0].shape[1]

    tile_b = _pick_tile_b(B)
    grid = (pl.cdiv(B, tile_b),)           # ragged last tile masked by Pallas

    # x streams tile-by-tile (double-buffered); weights/biases are
    # grid-invariant full-array blocks resident in VMEM across all steps.
    in_specs = [pl.BlockSpec((tile_b, d_in), lambda i: (i, 0))]
    flat_params = []
    flops = 0
    weight_bytes = 0
    for wp_, bp_ in prepared:
        kdim, ndim = wp_.shape
        if single_buffer_weights:
            w_spec = pl.BlockSpec((kdim, ndim), lambda i: (0, 0),
                                  pipeline_mode=pl.Buffered(1))
            b_spec = pl.BlockSpec((1, ndim), lambda i: (0, 0),
                                  pipeline_mode=pl.Buffered(1))
        else:
            w_spec = pl.BlockSpec((kdim, ndim), lambda i: (0, 0))
            b_spec = pl.BlockSpec((1, ndim), lambda i: (0, 0))
        in_specs += [w_spec, b_spec]
        flat_params += [wp_, bp_]
        flops += 2 * B * kdim * ndim
        weight_bytes += 4 * (kdim * ndim + ndim)
    bytes_accessed = 4 * (B * d_in + B * n_last_p) + weight_bytes

    out_specs = pl.BlockSpec((tile_b, n_last_p), lambda i: (i, 0))

    # VMEM budget: double-buffered x/out tiles + (single/double) weights +
    # intermediate activations.  Only raise the scoped-VMEM limit when the
    # conservative v5e default (16 MiB) would be exceeded; cap at v7x's 64 MiB.
    w_bufs = 1 if single_buffer_weights else 2
    vmem_need = 4 * tile_b * (2 * d_in + 2 * n_last_p) + w_bufs * weight_bytes
    vmem_need += 4 * tile_b * sum(wp.shape[1] for wp, _ in prepared)
    vmem_limit = None
    if vmem_need > 12 * 1024 * 1024:
        vmem_limit = min(_round_up(2 * vmem_need, 1 << 20), 64 * 1024 * 1024)

    out_padded = pl.pallas_call(
        functools.partial(_mlp_fused_kernel, num_layers=num_layers),
        out_shape=jax.ShapeDtypeStruct((B, n_last_p), jnp.float32),
        grid=grid,
        in_specs=in_specs,
        out_specs=out_specs,
        compiler_params=pltpu.CompilerParams(
            dimension_semantics=("parallel",),   # batch tiles independent
            vmem_limit_bytes=vmem_limit,
        ),
        cost_estimate=pl.CostEstimate(
            flops=flops, transcendentals=0, bytes_accessed=bytes_accessed),
    )(x, *flat_params)

    # TODO(synk): at large B fuse this column slice into the consumer (it is a
    # second HBM pass over the padded output); at demo sizes it is noise.
    return out_padded[:, :d_out]


_net_he_forward_jit = jax.jit(
    _net_he_forward_impl, static_argnames=("d_out", "single_buffer_weights"))


def net_he_forward(prepared, x, *, d_out):
    """Forward pass identical to Net_He.forward (all f32), fused into one
    pallas_call.  Tries single-buffered resident weights first and falls back
    to default double-buffering if this JAX build rejects pipeline_mode."""
    try:
        return _net_he_forward_jit(prepared, x, d_out=d_out,
                                   single_buffer_weights=True)
    except Exception:
        return _net_he_forward_jit(prepared, x, d_out=d_out,
                                   single_buffer_weights=False)


if __name__ == "__main__":
    # Small MLP consistent with the lab's Net_He(Layers) module (2 Linear
    # layers here; the kernel is generic in the number of layers).
    layers = [64, 32, 10]
    batch = 256   # -> 2 batch tiles of 128: pipelined, v7x-parallel grid

    key = jax.random.PRNGKey(0)
    key, kx = jax.random.split(key)
    x = jax.random.normal(kx, (batch, layers[0]), jnp.float32)

    params = init_net_he(key, layers)      # PyTorch [out, in] layout + He init
    prepared = prepare_params(params)      # one-time transpose + N-only padding

    out = net_he_forward(prepared, x, d_out=layers[-1])
    out = jax.block_until_ready(out)

    # Pure-JAX reference with exact nn.Linear semantics.
    ref = x
    for l, (w, b) in enumerate(params):
        ref = ref @ w.T + b
        if l < len(params) - 1:
            ref = jnp.maximum(ref, 0.0)

    assert out.shape == (batch, layers[-1])
    assert jnp.allclose(out, ref, atol=1e-4, rtol=1e-4)

    print("KERNEL_OK")
</pallas_src>

<mosaic_0001>
module attributes {stable_mosaic.version = 11 : i64} {
  func.func @_mlp_fused_kernel(%arg0: i32, %arg1: memref<128x64xf32, #tpu.memory_space<vmem>>, %arg2: memref<64x32xf32, #tpu.memory_space<vmem>>, %arg3: memref<1x32xf32, #tpu.memory_space<vmem>>, %arg4: memref<32x128xf32, #tpu.memory_space<vmem>>, %arg5: memref<1x128xf32, #tpu.memory_space<vmem>>, %arg6: memref<128x128xf32, #tpu.memory_space<vmem>>) attributes {dimension_semantics = [#tpu.dimension_semantics<parallel>], iteration_bounds = array<i64: 2>, scalar_prefetch = 0 : i64, scratch_operands = 0 : i64, tpu.core_type = #tpu.core_type<tc>, window_params = [{transform_indices = @transform_0, window_bounds = array<i64: 128, 64>}, {pipeline_mode = #tpu.pipeline_mode<synchronous>, transform_indices = @transform_1, window_bounds = array<i64: 64, 32>}, {pipeline_mode = #tpu.pipeline_mode<synchronous>, transform_indices = @transform_2, window_bounds = array<i64: 1, 32>}, {pipeline_mode = #tpu.pipeline_mode<synchronous>, transform_indices = @transform_3, window_bounds = array<i64: 32, 128>}, {pipeline_mode = #tpu.pipeline_mode<synchronous>, transform_indices = @transform_4, window_bounds = array<i64: 1, 128>}, {transform_indices = @transform_5, window_bounds = array<i64: 128, 128>}]} {
    %c0 = arith.constant 0 : index
    %c0_0 = arith.constant 0 : index
    %0 = vector.load %arg1[%c0, %c0_0] : memref<128x64xf32, #tpu.memory_space<vmem>>, vector<128x64xf32>
    %c0_1 = arith.constant 0 : index
    %c0_2 = arith.constant 0 : index
    %1 = vector.load %arg2[%c0_1, %c0_2] : memref<64x32xf32, #tpu.memory_space<vmem>>, vector<64x32xf32>
    %c0_3 = arith.constant 0 : index
    %c0_4 = arith.constant 0 : index
    %2 = vector.load %arg3[%c0_3, %c0_4] : memref<1x32xf32, #tpu.memory_space<vmem>>, vector<1x32xf32>
    %cst = arith.constant dense<0.000000e+00> : vector<128x32xf32>
    %3 = tpu.matmul %0, %1, %cst {dimension_numbers = #tpu.dot_dimension_numbers<[1], [0], [0], [1], [0, 0, 1, 1], [], []>} : vector<128x64xf32>, vector<64x32xf32>, vector<128x32xf32> -> vector<128x32xf32>
    %4 = vector.broadcast %2 : vector<1x32xf32> to vector<128x32xf32>
    %5 = arith.addf %3, %4 : vector<128x32xf32>
    %cst_5 = arith.constant 0.000000e+00 : f32
    %6 = vector.broadcast %cst_5 : f32 to vector<128x32xf32>
    %7 = arith.maximumf %5, %6 : vector<128x32xf32>
    %c0_6 = arith.constant 0 : index
    %c0_7 = arith.constant 0 : index
    %8 = vector.load %arg4[%c0_6, %c0_7] : memref<32x128xf32, #tpu.memory_space<vmem>>, vector<32x128xf32>
    %c0_8 = arith.constant 0 : index
    %c0_9 = arith.constant 0 : index
    %9 = vector.load %arg5[%c0_8, %c0_9] : memref<1x128xf32, #tpu.memory_space<vmem>>, vector<1x128xf32>
    %cst_10 = arith.constant dense<0.000000e+00> : vector<128x128xf32>
    %10 = tpu.matmul %7, %8, %cst_10 {dimension_numbers = #tpu.dot_dimension_numbers<[1], [0], [0], [1], [0, 0, 1, 1], [], []>} : vector<128x32xf32>, vector<32x128xf32>, vector<128x128xf32> -> vector<128x128xf32>
    %11 = vector.broadcast %9 : vector<1x128xf32> to vector<128x128xf32>
    %12 = arith.addf %10, %11 : vector<128x128xf32>
    %c0_11 = arith.constant 0 : index
    %c0_12 = arith.constant 0 : index
    %13 = vector.load %arg6[%c0_11, %c0_12] : memref<128x128xf32, #tpu.memory_space<vmem>>, vector<128x128xf32>
    tpu.vector_store %arg6[%c0_11, %c0_12], %12 {strides = array<i32>} : memref<128x128xf32, #tpu.memory_space<vmem>>, vector<128x128xf32>,
    return
  }
  func.func @transform_0(%arg0: i32) -> (i32, i32) {
    %c0_i32 = arith.constant 0 : i32
    %c0_i32_0 = arith.constant 0 : i32
    return %arg0, %c0_i32 : i32, i32
  }
  func.func @transform_1(%arg0: i32) -> (i32, i32) {
    %c0_i32 = arith.constant 0 : i32
    %c0_i32_0 = arith.constant 0 : i32
    %c0_i32_1 = arith.constant 0 : i32
    return %c0_i32, %c0_i32_0 : i32, i32
  }
  func.func @transform_2(%arg0: i32) -> (i32, i32) {
    %c0_i32 = arith.constant 0 : i32
    %c0_i32_0 = arith.constant 0 : i32
    %c0_i32_1 = arith.constant 0 : i32
    return %c0_i32, %c0_i32_0 : i32, i32
  }
  func.func @transform_3(%arg0: i32) -> (i32, i32) {
    %c0_i32 = arith.constant 0 : i32
    %c0_i32_0 = arith.constant 0 : i32
    %c0_i32_1 = arith.constant 0 : i32
    return %c0_i32, %c0_i32_0 : i32, i32
  }
  func.func @transform_4(%arg0: i32) -> (i32, i32) {
    %c0_i32 = arith.constant 0 : i32
    %c0_i32_0 = arith.constant 0 : i32
    %c0_i32_1 = arith.constant 0 : i32
    return %c0_i32, %c0_i32_0 : i32, i32
  }
  func.func @transform_5(%arg0: i32) -> (i32, i32) {
    %c0_i32 = arith.constant 0 : i32
    %c0_i32_0 = arith.constant 0 : i32
    return %arg0, %c0_i32 : i32, i32
  }
}

module attributes {stable_mosaic.version = 11 : i64} {
  func.func @_mlp_fused_kernel(%arg0: i32, %arg1: memref<128x64xf32, #tpu.memory_space<vmem>>, %arg2: memref<64x32xf32, #tpu.memory_space<vmem>>, %arg3: memref<1x32xf32, #tpu.memory_space<vmem>>, %arg4: memref<32x128xf32, #tpu.memory_space<vmem>>, %arg5: memref<1x128xf32, #tpu.memory_space<vmem>>, %arg6: memref<128x128xf32, #tpu.memory_space<vmem>>) attributes {dimension_semantics = [#tpu.dimension_semantics<parallel>], iteration_bounds = array<i64: 2>, scalar_prefetch = 0 : i64, scratch_operands = 0 : i64, tpu.core_type = #tpu.core_type<tc>, window_params = [{transform_indices = @transform_0, window_bounds = array<i64: 128, 64>}, {pipeline_mode = #tpu.pipeline_mode<synchronous>, transform_indices = @transform_1, window_bounds = array<i64: 64, 32>}, {pipeline_mode = #tpu.pipeline_mode<synchronous>, transform_indices = @transform_2, window_bounds = array<i64: 1, 32>}, {pipeline_mode = #tpu.pipeline_mode<synchronous>, transform_indices = @transform_3, window_bounds = array<i64: 32, 128>}, {pipeline_mode = #tpu.pipeline_mode<synchronous>, transform_indices = @transform_4, window_bounds = array<i64: 1, 128>}, {transform_indices = @transform_5, window_bounds = array<i64: 128, 128>}]} {
    %c0 = arith.constant 0 : index
    %c0_0 = arith.constant 0 : index
    %0 = vector.load %arg1[%c0, %c0_0] : memref<128x64xf32, #tpu.memory_space<vmem>>, vector<128x64xf32>
    %c0_1 = arith.constant 0 : index
    %c0_2 = arith.constant 0 : index
    %1 = vector.load %arg2[%c0_1, %c0_2] : memref<64x32xf32, #tpu.memory_space<vmem>>, vector<64x32xf32>
    %c0_3 = arith.constant 0 : index
    %c0_4 = arith.constant 0 : index
    %2 = vector.load %arg3[%c0_3, %c0_4] : memref<1x32xf32, #tpu.memory_space<vmem>>, vector<1x32xf32>
    %cst = arith.constant dense<0.000000e+00> : vector<128x32xf32>
    %3 = tpu.matmul %0, %1, %cst {dimension_numbers = #tpu.dot_dimension_numbers<[1], [0], [0], [1], [0, 0, 1, 1], [], []>} : vector<128x64xf32>, vector<64x32xf32>, vector<128x32xf32> -> vector<128x32xf32>
    %4 = vector.broadcast %2 : vector<1x32xf32> to vector<128x32xf32>
    %5 = arith.addf %3, %4 : vector<128x32xf32>
    %cst_5 = arith.constant 0.000000e+00 : f32
    %6 = vector.broadcast %cst_5 : f32 to vector<128x32xf32>
    %7 = arith.maximumf %5, %6 : vector<128x32xf32>
    %c0_6 = arith.constant 0 : index
    %c0_7 = arith.constant 0 : index
    %8 = vector.load %arg4[%c0_6, %c0_7] : memref<32x128xf32, #tpu.memory_space<vmem>>, vector<32x128xf32>
    %c0_8 = arith.constant 0 : index
    %c0_9 = arith.constant 0 : index
    %9 = vector.load %arg5[%c0_8, %c0_9] : memref<1x128xf32, #tpu.memory_space<vmem>>, vector<1x128xf32>
    %cst_10 = arith.constant dense<0.000000e+00> : vector<128x128xf32>
    %10 = tpu.matmul %7, %8, %cst_10 {dimension_numbers = #tpu.dot_dimension_numbers<[1], [0], [0], [1], [0, 0, 1, 1], [], []>} : vector<128x32xf32>, vector<32x128xf32>, vector<128x128xf32> -> vector<128x128xf32>
    %11 = vector.broadcast %9 : vector<1x128xf32> to vector<128x128xf32>
    %12 = arith.addf %10, %11 : vector<128x128xf32>
    %c0_11 = arith.constant 0 : index
    %c0_12 = arith.constant 0 : index
    %13 = vector.load %arg6[%c0_11, %c0_12] : memref<128x128xf32, #tpu.memory_space<vmem>>, vector<128x128xf32>
    tpu.vector_store %arg6[%c0_11, %c0_12], %12 {strides = array<i32>} : memref<128x128xf32, #tpu.memory_space<vmem>>, vector<128x128xf32>,
    return
  }
  func.func @transform_0(%arg0: i32) -> (i32, i32) {
    %c0_i32 = arith.constant 0 : i32
    %c0_i32_0 = arith.constant 0 : i32
    return %arg0, %c0_i32 : i32, i32
  }
  func.func @transform_1(%arg0: i32) -> (i32, i32) {
    %c0_i32 = arith.constant 0 : i32
    %c0_i32_0 = arith.constant 0 : i32
    %c0_i32_1 = arith.constant 0 : i32
    return %c0_i32, %c0_i32_0 : i32, i32
  }
  func.func @transform_2(%arg0: i32) -> (i32, i32) {
    %c0_i32 = arith.constant 0 : i32
    %c0_i32_0 = arith.constant 0 : i32
    %c0_i32_1 = arith.constant 0 : i32
    return %c0_i32, %c0_i32_0 : i32, i32
  }
  func.func @transform_3(%arg0: i32) -> (i32, i32) {
    %c0_i32 = arith.constant 0 : i32
    %c0_i32_0 = arith.constant 0 : i32
    %c0_i32_1 = arith.constant 0 : i32
    return %c0_i32, %c0_i32_0 : i32, i32
  }
  func.func @transform_4(%arg0: i32) -> (i32, i32) {
    %c0_i32 = arith.constant 0 : i32
    %c0_i32_0 = arith.constant 0 : i32
    %c0_i32_1 = arith.constant 0 : i32
    return %c0_i32, %c0_i32_0 : i32, i32
  }
  func.func @transform_5(%arg0: i32) -> (i32, i32) {
    %c0_i32 = arith.constant 0 : i32
    %c0_i32_0 = arith.constant 0 : i32
    return %arg0, %c0_i32 : i32, i32
  }
}

</mosaic_0001>

<bundles_post_ra>
// kernel: _net_he_forward_impl.1
= control target key start
LH: loop header
LB: loop body
LE: loop exit
PB: predicated region body
PF: predicated region fallthrough
CT: control target
= control target key end

     0   :  { %s953_s18 = smov 0   ;;  %s1087_s0 = inlined_call_operand.vmem [shape: f32[256,64], index: 0, kind: input, shape index: {}]   ;;  %s1088_s1 = inlined_call_operand.vmem [shape: f32[64,32], index: 1, kind: input, shape index: {}]   ;;  %s1089_s2 = inlined_call_operand.vmem [shape: f32[1,32], index: 2, kind: input, shape index: {}]   ;;  %s1090_s3 = inlined_call_operand.vmem [shape: f32[32,128], index: 3, kind: input, shape index: {}]   ;;  %s1091_s4 = inlined_call_operand.vmem [shape: f32[1,128], index: 4, kind: input, shape index: {}]   ;;  %s1092_s5 = inlined_call_operand.vmem [shape: f32[256,128], index: 5, kind: output, shape index: {}]  }
   0x1 LB: > { %s746_s19 = sadd.s32 4294967295, %s921_s18   ;;  %p750_p0 = scmp.ge.s32.totalorder %s921_s18, 1  ;;  %s921_s18 = sphi %s953_s18, %s15_s18  }
   0x2   : > { %p188_p1 = scmp.lt.s32.totalorder %s921_s18, 3 }
   0x4   : > { %p189_p2 = pnand %p750_p0, %p188_p1 }
   0x5   : > { %s751_s24 = sshll.u32 (!%p189_p2), %s746_s19, 4 }
   0x6   : > { %192 = sbr.rel (%p189_p2) target bundleno = 454 (0x1c6), region = 40  ;;  %p217_p3 = scmp.lt.s32.totalorder (!%p189_p2), %s751_s24, 31 }
   0xb   : > { %v251_v0 = vld [vmem:[%s1088_s1 + $0x38] sm:$0xff]  ;;  %v250_v1 = vld [vmem:[%s1088_s1 + $0x30] sm:$0xff]  ;;  %v249_v2 = vld [vmem:[%s1088_s1 + $0x28] sm:$0xff]  ;;  %s1094_s24 = smov (!%p217_p3, %s751_s24), 31  ;;  %vm259_vm0 = vcmask 523264   ;;  %vm480_vm1 = vcmask 261120  }
   0xc   : > { %835 = vmatprep.subr.mxu0 %v251_v0  ;;  %v248_v3 = vld [vmem:[%s1088_s1 + $0x20] sm:$0xff]  ;;  %s752_s29 = sshll.u32 %s1094_s24, 3  ;;  %v247_v4 = vld [vmem:[%s1088_s1 + $0x18] sm:$0xff]  ;;  %v246_v6 = vld [vmem:[%s1088_s1 + $0x10] sm:$0xff] }
   0xd   : > { %836 = vmatpush3.msra.mxu0 %v251_v0  ;;  %s984_s9 = scalar_lea.vmem %s1087_s0, %s752_s29  ;;  %v245_v7 = vld [vmem:[%s1088_s1 + $0x8] sm:$0xff]  ;;  %v244_v8 = vld [vmem:[%s1088_s1] sm:$0xff]  ;;  %v472_v24 = vld [vmem:[%s1090_s3 + $0x18] sm:$0xff]  ;;  %s1066_s8 = scalar_lea.vmem %s1092_s5, %s752_s29 }
   0xe   : > { %837 = vmatprep.subr.mxu0 %v250_v1  ;;  %v228_v5 = vld [vmem:[%s984_s9] sm:$0xff]  ;;  %v229_v9 = vld [vmem:[%s984_s9 + $0x8] sm:$0xff]  ;;  %v230_v10 = vld [vmem:[%s984_s9 + $0x10] sm:$0xff]  ;;  %875 = vmatprep.subr.mxu1 %v472_v24 }
   0xf   : > { %838 = vmatpush3.msra.mxu0 %v250_v1  ;;  %851 = vmatprep.mubr.msk.f32.mxu0 %vm259_vm0, %v228_v5  ;;  %v231_v11 = vld [vmem:[%s984_s9 + $0x18] sm:$0xff]  ;;  %v232_v12 = vld [vmem:[%s984_s9 + $0x20] sm:$0xff]  ;;  %v233_v13 = vld [vmem:[%s984_s9 + $0x28] sm:$0xff] }
  0x10   : > { %839 = vmatprep.subr.mxu0 %v249_v2  ;;  %v234_v14 = vld [vmem:[%s984_s9 + $0x30] sm:$0xff]  ;;  %v235_v15 = vld [vmem:[%s984_s9 + $0x38] sm:$0xff]  ;;  %v236_v16 = vld [vmem:[%s984_s9 + $0x40] sm:$0xff]  ;;  %876 = vmatpush3.msra.mxu1 %v472_v24 }
  0x11   : > { %840 = vmatpush3.msra.mxu0 %v249_v2  ;;  %v237_v17 = vld [vmem:[%s984_s9 + $0x48] sm:$0xff]  ;;  %v238_v18 = vld [vmem:[%s984_s9 + $0x50] sm:$0xff]  ;;  %v239_v19 = vld [vmem:[%s984_s9 + $0x58] sm:$0xff] }
  0x12   : > { %841 = vmatprep.subr.mxu0 %v248_v3  ;;  %v240_v20 = vld [vmem:[%s984_s9 + $0x60] sm:$0xff]  ;;  %v241_v21 = vld [vmem:[%s984_s9 + $0x68] sm:$0xff]  ;;  %v242_v22 = vld [vmem:[%s984_s9 + $0x70] sm:$0xff] }
  0x13   : > { %842 = vmatpush3.msra.mxu0 %v248_v3  ;;  %v243_v23 = vld [vmem:[%s984_s9 + $0x78] sm:$0xff]  ;;  %v471_v25 = vld [vmem:[%s1090_s3 + $0x10] sm:$0xff]  ;;  %v470_v26 = vld [vmem:[%s1090_s3 + $0x8] sm:$0xff] }
  0x14   : > { %843 = vmatprep.subr.mxu0 %v247_v4  ;;  %877 = vmatprep.subr.mxu1 %v471_v25  ;;  %v469_v27 = vld [vmem:[%s1090_s3] sm:$0xff] }
  0x15   : > { %844 = vmatpush3.msra.mxu0 %v247_v4  ;;  %878 = vmatpush3.msra.mxu1 %v471_v25  ;;  %v755_v28 = vld [vmem:[%s1089_s2] ss:$0 sm:$0xff] }
  0x16   : > { %845 = vmatprep.subr.mxu0 %v246_v6  ;;  %879 = vmatprep.subr.mxu1 %v470_v26 }
  0x17   : > { %846 = vmatpush3.msra.mxu0 %v246_v6  ;;  %880 = vmatpush3.msra.mxu1 %v470_v26 }
  0x18   : > { %847 = vmatprep.subr.mxu0 %v245_v7  ;;  %881 = vmatprep.subr.mxu1 %v469_v27 }
  0x19   : > { %848 = vmatpush3.msra.mxu0 %v245_v7  ;;  %882 = vmatpush3.msra.mxu1 %v469_v27 }
  0x1a   : > { %849 = vmatprep.subr.mxu0 %v244_v8 }
  0x1b   : > { %850 = vmatpush3.msra.mxu0 %v244_v8 }
  0x1c   : > { %852 = vmatmul.mubr.msk.f32.vlgmr.msra.gmra.mxu0 %vm259_vm0, %v229_v9 }
  0x1d   : > { %854 = vmatprep.mubr.msk.f32.mxu0 %vm259_vm0, %v230_v10 }
  0x20   : > { %855 = vmatmul.mubr.msk.f32.gmra.mxu0 %vm259_vm0, %v231_v11 }
  0x21   : > { %857 = vmatprep.mubr.msk.f32.mxu0 %vm259_vm0, %v232_v12 }
  0x24   : > { %858 = vmatmul.mubr.msk.f32.gmra.mxu0 %vm259_vm0, %v233_v13  ;;  %v772_v13 = vld [vmem:[%s1091_s4] ss:$0 sm:$0xff] }
  0x25   : > { %860 = vmatprep.mubr.msk.f32.mxu0 %vm259_vm0, %v234_v14 }
  0x28   : > { %861 = vmatmul.mubr.msk.f32.gmra.mxu0 %vm259_vm0, %v235_v15 }
  0x29   : > { %863 = vmatprep.mubr.msk.f32.mxu0 %vm259_vm0, %v236_v16 }
  0x2c   : > { %864 = vmatmul.mubr.msk.f32.gmra.mxu0 %vm259_vm0, %v237_v17 }
  0x2d   : > { %866 = vmatprep.mubr.msk.f32.mxu0 %vm259_vm0, %v238_v18 }
  0x30   : > { %867 = vmatmul.mubr.msk.f32.gmra.mxu0 %vm259_vm0, %v239_v19 }
  0x31   : > { %869 = vmatprep.mubr.msk.f32.mxu0 %vm259_vm0, %v240_v20 }
  0x34   : > { %870 = vmatmul.mubr.msk.f32.gmra.mxu0 %vm259_vm0, %v241_v21 }
  0x35   : > { %872 = vmatprep.mubr.msk.f32.mxu0 %vm259_vm0, %v242_v22 }
  0x38   : > { %873 = vmatmul.mubr.msk.f32.gmra.mxu0 %vm259_vm0, %v243_v23 }
  0xdc   : > { %v853_v29 = vpop.f32.mrf.mxu0 }
  0xdd   : > { %v380_v30 = vadd.f32 %v853_v29, %v755_v28 }
  0xde   : > { %v374_v31 = vpop.f32.mrf.mxu0 }
  0xdf   : > { %v375_v32 = vadd.f32 %v755_v28, %v374_v31  ;;  %v454_v35 = vmax.f32 %v380_v30, 0.0 }
  0xe0   : > { %v856_v33 = vpop.f32.mrf.mxu0 }
  0xe1   : > { %v453_v34 = vmax.f32 %v375_v32, 0.0  ;;  %v390_v36 = vadd.f32 %v856_v33, %v755_v28 }
  0xe2   : > { %v384_v37 = vpop.f32.mrf.mxu0 }
  0xe3   : > { %v385_v38 = vadd.f32 %v755_v28, %v384_v37  ;;  %883 = vmatprep.mubr.msk.f32.mxu1 %vm480_vm1, %v453_v34  ;;  %v456_v41 = vmax.f32 %v390_v36, 0.0 }
  0xe4   : > { %v859_v39 = vpop.f32.mrf.mxu0  ;;  %884 = vmatmul.mubr.msk.f32.vlgmr.msra.gmra.mxu1 %vm480_vm1, %v454_v35 }
  0xe5   : > { %v455_v40 = vmax.f32 %v385_v38, 0.0  ;;  %v400_v42 = vadd.f32 %v859_v39, %v755_v28 }
  0xe6   : > { %v394_v43 = vpop.f32.mrf.mxu0 }
  0xe7   : > { %v395_v44 = vadd.f32 %v755_v28, %v394_v43  ;;  %886 = vmatprep.mubr.msk.f32.mxu1 %vm480_vm1, %v455_v40  ;;  %v458_v47 = vmax.f32 %v400_v42, 0.0 }
  0xe8   : > { %v862_v45 = vpop.f32.mrf.mxu0  ;;  %887 = vmatmul.mubr.msk.f32.gmra.mxu1 %vm480_vm1, %v456_v41 }
  0xe9   : > { %v457_v46 = vmax.f32 %v395_v44, 0.0  ;;  %v410_v48 = vadd.f32 %v862_v45, %v755_v28 }
  0xea   : > { %v404_v49 = vpop.f32.mrf.mxu0 }
  0xeb   : > { %v405_v50 = vadd.f32 %v755_v28, %v404_v49  ;;  %889 = vmatprep.mubr.msk.f32.mxu1 %vm480_vm1, %v457_v46  ;;  %v460_v53 = vmax.f32 %v410_v48, 0.0 }
  0xec   : > { %v865_v51 = vpop.f32.mrf.mxu0  ;;  %890 = vmatmul.mubr.msk.f32.gmra.mxu1 %vm480_vm1, %v458_v47 }
  0xed   : > { %v459_v52 = vmax.f32 %v405_v50, 0.0  ;;  %v420_v54 = vadd.f32 %v865_v51, %v755_v28 }
  0xee   : > { %v414_v55 = vpop.f32.mrf.mxu0 }
  0xef   : > { %v415_v56 = vadd.f32 %v755_v28, %v414_v55  ;;  %892 = vmatprep.mubr.msk.f32.mxu1 %vm480_vm1, %v459_v52  ;;  %v462_v59 = vmax.f32 %v420_v54, 0.0 }
  0xf0   : > { %v868_v57 = vpop.f32.mrf.mxu0  ;;  %893 = vmatmul.mubr.msk.f32.gmra.mxu1 %vm480_vm1, %v460_v53 }
  0xf1   : > { %v461_v58 = vmax.f32 %v415_v56, 0.0  ;;  %v430_v60 = vadd.f32 %v868_v57, %v755_v28 }
  0xf2   : > { %v424_v61 = vpop.f32.mrf.mxu0 }
  0xf3   : > { %v425_v62 = vadd.f32 %v755_v28, %v424_v61  ;;  %895 = vmatprep.mubr.msk.f32.mxu1 %vm480_vm1, %v461_v58  ;;  %v464_v1 = vmax.f32 %v430_v60, 0.0 }
  0xf4   : > { %v871_v63 = vpop.f32.mrf.mxu0  ;;  %896 = vmatmul.mubr.msk.f32.gmra.mxu1 %vm480_vm1, %v462_v59 }
  0xf5   : > { %v463_v0 = vmax.f32 %v425_v62, 0.0  ;;  %v440_v2 = vadd.f32 %v871_v63, %v755_v28 }
  0xf6   : > { %v434_v3 = vpop.f32.mrf.mxu0 }
  0xf7   : > { %v435_v4 = vadd.f32 %v755_v28, %v434_v3  ;;  %898 = vmatprep.mubr.msk.f32.mxu1 %vm480_vm1, %v463_v0  ;;  %v466_v7 = vmax.f32 %v440_v2, 0.0 }
  0xf8   : > { %v874_v5 = vpop.f32.mrf.mxu0  ;;  %899 = vmatmul.mubr.msk.f32.gmra.mxu1 %vm480_vm1, %v464_v1 }
  0xf9   : > { %v465_v6 = vmax.f32 %v435_v4, 0.0  ;;  %v450_v8 = vadd.f32 %v874_v5, %v755_v28 }
  0xfa   : > { %v444_v9 = vpop.f32.mrf.mxu0 }
  0xfb   : > { %v445_v10 = vadd.f32 %v755_v28, %v444_v9  ;;  %901 = vmatprep.mubr.msk.f32.mxu1 %vm480_vm1, %v465_v6  ;;  %v468_v12 = vmax.f32 %v450_v8, 0.0 }
  0xfc   : > { %902 = vmatmul.mubr.msk.f32.gmra.mxu1 %vm480_vm1, %v466_v7 }
  0xfd   : > { %v467_v11 = vmax.f32 %v445_v10, 0.0 }
  0xff   : > { %904 = vmatprep.mubr.msk.f32.mxu1 %vm480_vm1, %v467_v11 }
 0x100   : > { %905 = vmatmul.mubr.msk.f32.gmra.mxu1 %vm480_vm1, %v468_v12 }
 0x1a4   : > { %v885_v14 = vpop.f32.mrf.mxu1 }
 0x1a5   : > { %v601_v15 = vadd.f32 %v885_v14, %v772_v13 }
 0x1a6   : > { %v595_v16 = vpop.f32.mrf.mxu1 }
 0x1a7   : > { %675 = vst [vmem:[%s1066_s8 + $0x8] sm:$0xff] %v601_v15  ;;  %v596_v17 = vadd.f32 %v772_v13, %v595_v16 }
 0x1a8   : > { %v888_v18 = vpop.f32.mrf.mxu1 }
 0x1a9   : > { %674 = vst [vmem:[%s1066_s8] sm:$0xff] %v596_v17  ;;  %v611_v19 = vadd.f32 %v888_v18, %v772_v13 }
 0x1aa   : > { %v605_v20 = vpop.f32.mrf.mxu1 }
 0x1ab   : > { %677 = vst [vmem:[%s1066_s8 + $0x18] sm:$0xff] %v611_v19  ;;  %v606_v21 = vadd.f32 %v772_v13, %v605_v20 }
 0x1ac   : > { %v891_v22 = vpop.f32.mrf.mxu1 }
 0x1ad   : > { %676 = vst [vmem:[%s1066_s8 + $0x10] sm:$0xff] %v606_v21  ;;  %v621_v23 = vadd.f32 %v891_v22, %v772_v13 }
 0x1ae   : > { %v615_v24 = vpop.f32.mrf.mxu1 }
 0x1af   : > { %679 = vst [vmem:[%s1066_s8 + $0x28] sm:$0xff] %v621_v23  ;;  %v616_v25 = vadd.f32 %v772_v13, %v615_v24 }
 0x1b0   : > { %v894_v26 = vpop.f32.mrf.mxu1 }
 0x1b1   : > { %678 = vst [vmem:[%s1066_s8 + $0x20] sm:$0xff] %v616_v25  ;;  %v631_v27 = vadd.f32 %v894_v26, %v772_v13 }
 0x1b2   : > { %v625_v28 = vpop.f32.mrf.mxu1 }
 0x1b3   : > { %681 = vst [vmem:[%s1066_s8 + $0x38] sm:$0xff] %v631_v27  ;;  %v626_v29 = vadd.f32 %v772_v13, %v625_v28 }
 0x1b4   : > { %v897_v30 = vpop.f32.mrf.mxu1 }
 0x1b5   : > { %680 = vst [vmem:[%s1066_s8 + $0x30] sm:$0xff] %v626_v29  ;;  %v641_v31 = vadd.f32 %v897_v30, %v772_v13 }
 0x1b6   : > { %v635_v32 = vpop.f32.mrf.mxu1 }
 0x1b7   : > { %683 = vst [vmem:[%s1066_s8 + $0x48] sm:$0xff] %v641_v31  ;;  %v636_v33 = vadd.f32 %v772_v13, %v635_v32 }
 0x1b8   : > { %v900_v34 = vpop.f32.mrf.mxu1 }
 0x1b9   : > { %682 = vst [vmem:[%s1066_s8 + $0x40] sm:$0xff] %v636_v33  ;;  %v651_v35 = vadd.f32 %v900_v34, %v772_v13 }
 0x1ba   : > { %v645_v36 = vpop.f32.mrf.mxu1 }
 0x1bb   : > { %685 = vst [vmem:[%s1066_s8 + $0x58] sm:$0xff] %v651_v35  ;;  %v646_v37 = vadd.f32 %v772_v13, %v645_v36 }
 0x1bc   : > { %v903_v38 = vpop.f32.mrf.mxu1 }
 0x1bd   : > { %684 = vst [vmem:[%s1066_s8 + $0x50] sm:$0xff] %v646_v37  ;;  %v661_v39 = vadd.f32 %v903_v38, %v772_v13 }
 0x1be   : > { %v655_v40 = vpop.f32.mrf.mxu1 }
 0x1bf   : > { %687 = vst [vmem:[%s1066_s8 + $0x68] sm:$0xff] %v661_v39  ;;  %v656_v41 = vadd.f32 %v772_v13, %v655_v40 }
 0x1c0   : > { %v906_v42 = vpop.f32.mrf.mxu1 }
 0x1c1   : > { %686 = vst [vmem:[%s1066_s8 + $0x60] sm:$0xff] %v656_v41  ;;  %v671_v43 = vadd.f32 %v906_v42, %v772_v13 }
 0x1c2   : > { %v665_v44 = vpop.f32.mrf.mxu1 }
 0x1c3   : > { %689 = vst [vmem:[%s1066_s8 + $0x78] sm:$0xff] %v671_v43  ;;  %v666_v45 = vadd.f32 %v772_v13, %v665_v44 }
 0x1c5   : > { %688 = vst [vmem:[%s1066_s8 + $0x70] sm:$0xff] %v666_v45 }
 0x1c6 PF: > { %s15_s18 = sadd.s32 1, %s921_s18  }
 0x1c7   : > { %p12_p4 = scmp.ge.s32.totalorder %s15_s18, 4  }
 0x1c9   :  { %14 = sbr.rel (!%p12_p4) target bundleno = 1 (0x1), region = 70 }

// kernel: _net_he_forward_impl.1
= control target key start
LH: loop header
LB: loop body
LE: loop exit
PB: predicated region body
PF: predicated region fallthrough
CT: control target
= control target key end

     0   :  { %s953_s18 = smov 0   ;;  %s1087_s0 = inlined_call_operand.vmem [shape: f32[256,64], index: 0, kind: input, shape index: {}]   ;;  %s1088_s1 = inlined_call_operand.vmem [shape: f32[64,32], index: 1, kind: input, shape index: {}]   ;;  %s1089_s2 = inlined_call_operand.vmem [shape: f32[1,32], index: 2, kind: input, shape index: {}]   ;;  %s1090_s3 = inlined_call_operand.vmem [shape: f32[32,128], index: 3, kind: input, shape index: {}]   ;;  %s1091_s4 = inlined_call_operand.vmem [shape: f32[1,128], index: 4, kind: input, shape index: {}]   ;;  %s1092_s5 = inlined_call_operand.vmem [shape: f32[256,128], index: 5, kind: output, shape index: {}]  }
   0x1 LB: > { %s746_s19 = sadd.s32 4294967295, %s921_s18   ;;  %p750_p0 = scmp.ge.s32.totalorder %s921_s18, 1  ;;  %s921_s18 = sphi %s953_s18, %s15_s18  }
   0x2   : > { %p188_p1 = scmp.lt.s32.totalorder %s921_s18, 3 }
   0x4   : > { %p189_p2 = pnand %p750_p0, %p188_p1 }
   0x5   : > { %s751_s24 = sshll.u32 (!%p189_p2), %s746_s19, 4 }
   0x6   : > { %192 = sbr.rel (%p189_p2) target bundleno = 454 (0x1c6), region = 40  ;;  %p217_p3 = scmp.lt.s32.totalorder (!%p189_p2), %s751_s24, 31 }
   0xb   : > { %v251_v0 = vld [vmem:[%s1088_s1 + $0x38] sm:$0xff]  ;;  %v250_v1 = vld [vmem:[%s1088_s1 + $0x30] sm:$0xff]  ;;  %v249_v2 = vld [vmem:[%s1088_s1 + $0x28] sm:$0xff]  ;;  %s1094_s24 = smov (!%p217_p3, %s751_s24), 31  ;;  %vm259_vm0 = vcmask 523264   ;;  %vm480_vm1 = vcmask 261120  }
   0xc   : > { %835 = vmatprep.subr.mxu0 %v251_v0  ;;  %v248_v3 = vld [vmem:[%s1088_s1 + $0x20] sm:$0xff]  ;;  %s752_s29 = sshll.u32 %s1094_s24, 3  ;;  %v247_v4 = vld [vmem:[%s1088_s1 + $0x18] sm:$0xff]  ;;  %v246_v6 = vld [vmem:[%s1088_s1 + $0x10] sm:$0xff] }
   0xd   : > { %836 = vmatpush3.msra.mxu0 %v251_v0  ;;  %s984_s9 = scalar_lea.vmem %s1087_s0, %s752_s29  ;;  %v245_v7 = vld [vmem:[%s1088_s1 + $0x8] sm:$0xff]  ;;  %v244_v8 = vld [vmem:[%s1088_s1] sm:$0xff]  ;;  %v472_v24 = vld [vmem:[%s1090_s3 + $0x18] sm:$0xff]  ;;  %s1066_s8 = scalar_lea.vmem %s1092_s5, %s752_s29 }
   0xe   : > { %837 = vmatprep.subr.mxu0 %v250_v1  ;;  %v228_v5 = vld [vmem:[%s984_s9] sm:$0xff]  ;;  %v229_v9 = vld [vmem:[%s984_s9 + $0x8] sm:$0xff]  ;;  %v230_v10 = vld [vmem:[%s984_s9 + $0x10] sm:$0xff]  ;;  %875 = vmatprep.subr.mxu1 %v472_v24 }
   0xf   : > { %838 = vmatpush3.msra.mxu0 %v250_v1  ;;  %851 = vmatprep.mubr.msk.f32.mxu0 %vm259_vm0, %v228_v5  ;;  %v231_v11 = vld [vmem:[%s984_s9 + $0x18] sm:$0xff]  ;;  %v232_v12 = vld [vmem:[%s984_s9 + $0x20] sm:$0xff]  ;;  %v233_v13 = vld [vmem:[%s984_s9 + $0x28] sm:$0xff] }
  0x10   : > { %839 = vmatprep.subr.mxu0 %v249_v2  ;;  %v234_v14 = vld [vmem:[%s984_s9 + $0x30] sm:$0xff]  ;;  %v235_v15 = vld [vmem:[%s984_s9 + $0x38] sm:$0xff]  ;;  %v236_v16 = vld [vmem:[%s984_s9 + $0x40] sm:$0xff]  ;;  %876 = vmatpush3.msra.mxu1 %v472_v24 }
  0x11   : > { %840 = vmatpush3.msra.mxu0 %v249_v2  ;;  %v237_v17 = vld [vmem:[%s984_s9 + $0x48] sm:$0xff]  ;;  %v238_v18 = vld [vmem:[%s984_s9 + $0x50] sm:$0xff]  ;;  %v239_v19 = vld [vmem:[%s984_s9 + $0x58] sm:$0xff] }
  0x12   : > { %841 = vmatprep.subr.mxu0 %v248_v3  ;;  %v240_v20 = vld [vmem:[%s984_s9 + $0x60] sm:$0xff]  ;;  %v241_v21 = vld [vmem:[%s984_s9 + $0x68] sm:$0xff]  ;;  %v242_v22 = vld [vmem:[%s984_s9 + $0x70] sm:$0xff] }
  0x13   : > { %842 = vmatpush3.msra.mxu0 %v248_v3  ;;  %v243_v23 = vld [vmem:[%s984_s9 + $0x78] sm:$0xff]  ;;  %v471_v25 = vld [vmem:[%s1090_s3 + $0x10] sm:$0xff]  ;;  %v470_v26 = vld [vmem:[%s1090_s3 + $0x8] sm:$0xff] }
  0x14   : > { %843 = vmatprep.subr.mxu0 %v247_v4  ;;  %877 = vmatprep.subr.mxu1 %v471_v25  ;;  %v469_v27 = vld [vmem:[%s1090_s3] sm:$0xff] }
  0x15   : > { %844 = vmatpush3.msra.mxu0 %v247_v4  ;;  %878 = vmatpush3.msra.mxu1 %v471_v25  ;;  %v755_v28 = vld [vmem:[%s1089_s2] ss:$0 sm:$0xff] }
  0x16   : > { %845 = vmatprep.subr.mxu0 %v246_v6  ;;  %879 = vmatprep.subr.mxu1 %v470_v26 }
  0x17   : > { %846 = vmatpush3.msra.mxu0 %v246_v6  ;;  %880 = vmatpush3.msra.mxu1 %v470_v26 }
  0x18   : > { %847 = vmatprep.subr.mxu0 %v245_v7  ;;  %881 = vmatprep.subr.mxu1 %v469_v27 }
  0x19   : > { %848 = vmatpush3.msra.mxu0 %v245_v7  ;;  %882 = vmatpush3.msra.mxu1 %v469_v27 }
  0x1a   : > { %849 = vmatprep.subr.mxu0 %v244_v8 }
  0x1b   : > { %850 = vmatpush3.msra.mxu0 %v244_v8 }
  0x1c   : > { %852 = vmatmul.mubr.msk.f32.vlgmr.msra.gmra.mxu0 %vm259_vm0, %v229_v9 }
  0x1d   : > { %854 = vmatprep.mubr.msk.f32.mxu0 %vm259_vm0, %v230_v10 }
  0x20   : > { %855 = vmatmul.mubr.msk.f32.gmra.mxu0 %vm259_vm0, %v231_v11 }
  0x21   : > { %857 = vmatprep.mubr.msk.f32.mxu0 %vm259_vm0, %v232_v12 }
  0x24   : > { %858 = vmatmul.mubr.msk.f32.gmra.mxu0 %vm259_vm0, %v233_v13  ;;  %v772_v13 = vld [vmem:[%s1091_s4] ss:$0 sm:$0xff] }
  0x25   : > { %860 = vmatprep.mubr.msk.f32.mxu0 %vm259_vm0, %v234_v14 }
  0x28   : > { %861 = vmatmul.mubr.msk.f32.gmra.mxu0 %vm259_vm0, %v235_v15 }
  0x29   : > { %863 = vmatprep.mubr.msk.f32.mxu0 %vm259_vm0, %v236_v16 }
  0x2c   : > { %864 = vmatmul.mubr.msk.f32.gmra.mxu0 %vm259_vm0, %v237_v17 }
  0x2d   : > { %866 = vmatprep.mubr.msk.f32.mxu0 %vm259_vm0, %v238_v18 }
  0x30   : > { %867 = vmatmul.mubr.msk.f32.gmra.mxu0 %vm259_vm0, %v239_v19 }
  0x31   : > { %869 = vmatprep.mubr.msk.f32.mxu0 %vm259_vm0, %v240_v20 }
  0x34   : > { %870 = vmatmul.mubr.msk.f32.gmra.mxu0 %vm259_vm0, %v241_v21 }
  0x35   : > { %872 = vmatprep.mubr.msk.f32.mxu0 %vm259_vm0, %v242_v22 }
  0x38   : > { %873 = vmatmul.mubr.msk.f32.gmra.mxu0 %vm259_vm0, %v243_v23 }
  0xdc   : > { %v853_v29 = vpop.f32.mrf.mxu0 }
  0xdd   : > { %v380_v30 = vadd.f32 %v853_v29, %v755_v28 }
  0xde   : > { %v374_v31 = vpop.f32.mrf.mxu0 }
  0xdf   : > { %v375_v32 = vadd.f32 %v755_v28, %v374_v31  ;;  %v454_v35 = vmax.f32 %v380_v30, 0.0 }
  0xe0   : > { %v856_v33 = vpop.f32.mrf.mxu0 }
  0xe1   : > { %v453_v34 = vmax.f32 %v375_v32, 0.0  ;;  %v390_v36 = vadd.f32 %v856_v33, %v755_v28 }
  0xe2   : > { %v384_v37 = vpop.f32.mrf.mxu0 }
  0xe3   : > { %v385_v38 = vadd.f32 %v755_v28, %v384_v37  ;;  %883 = vmatprep.mubr.msk.f32.mxu1 %vm480_vm1, %v453_v34  ;;  %v456_v41 = vmax.f32 %v390_v36, 0.0 }
  0xe4   : > { %v859_v39 = vpop.f32.mrf.mxu0  ;;  %884 = vmatmul.mubr.msk.f32.vlgmr.msra.gmra.mxu1 %vm480_vm1, %v454_v35 }
  0xe5   : > { %v455_v40 = vmax.f32 %v385_v38, 0.0  ;;  %v400_v42 = vadd.f32 %v859_v39, %v755_v28 }
  0xe6   : > { %v394_v43 = vpop.f32.mrf.mxu0 }
  0xe7   : > { %v395_v44 = vadd.f32 %v755_v28, %v394_v43  ;;  %886 = vmatprep.mubr.msk.f32.mxu1 %vm480_vm1, %v455_v40  ;;  %v458_v47 = vmax.f32 %v400_v42, 0.0 }
  0xe8   : > { %v862_v45 = vpop.f32.mrf.mxu0  ;;  %887 = vmatmul.mubr.msk.f32.gmra.mxu1 %vm480_vm1, %v456_v41 }
  0xe9   : > { %v457_v46 = vmax.f32 %v395_v44, 0.0  ;;  %v410_v48 = vadd.f32 %v862_v45, %v755_v28 }
  0xea   : > { %v404_v49 = vpop.f32.mrf.mxu0 }
  0xeb   : > { %v405_v50 = vadd.f32 %v755_v28, %v404_v49  ;;  %889 = vmatprep.mubr.msk.f32.mxu1 %vm480_vm1, %v457_v46  ;;  %v460_v53 = vmax.f32 %v410_v48, 0.0 }
  0xec   : > { %v865_v51 = vpop.f32.mrf.mxu0  ;;  %890 = vmatmul.mubr.msk.f32.gmra.mxu1 %vm480_vm1, %v458_v47 }
  0xed   : > { %v459_v52 = vmax.f32 %v405_v50, 0.0  ;;  %v420_v54 = vadd.f32 %v865_v51, %v755_v28 }
  0xee   : > { %v414_v55 = vpop.f32.mrf.mxu0 }
  0xef   : > { %v415_v56 = vadd.f32 %v755_v28, %v414_v55  ;;  %892 = vmatprep.mubr.msk.f32.mxu1 %vm480_vm1, %v459_v52  ;;  %v462_v59 = vmax.f32 %v420_v54, 0.0 }
  0xf0   : > { %v868_v57 = vpop.f32.mrf.mxu0  ;;  %893 = vmatmul.mubr.msk.f32.gmra.mxu1 %vm480_vm1, %v460_v53 }
  0xf1   : > { %v461_v58 = vmax.f32 %v415_v56, 0.0  ;;  %v430_v60 = vadd.f32 %v868_v57, %v755_v28 }
  0xf2   : > { %v424_v61 = vpop.f32.mrf.mxu0 }
  0xf3   : > { %v425_v62 = vadd.f32 %v755_v28, %v424_v61  ;;  %895 = vmatprep.mubr.msk.f32.mxu1 %vm480_vm1, %v461_v58  ;;  %v464_v1 = vmax.f32 %v430_v60, 0.0 }
  0xf4   : > { %v871_v63 = vpop.f32.mrf.mxu0  ;;  %896 = vmatmul.mubr.msk.f32.gmra.mxu1 %vm480_vm1, %v462_v59 }
  0xf5   : > { %v463_v0 = vmax.f32 %v425_v62, 0.0  ;;  %v440_v2 = vadd.f32 %v871_v63, %v755_v28 }
  0xf6   : > { %v434_v3 = vpop.f32.mrf.mxu0 }
  0xf7   : > { %v435_v4 = vadd.f32 %v755_v28, %v434_v3  ;;  %898 = vmatprep.mubr.msk.f32.mxu1 %vm480_vm1, %v463_v0  ;;  %v466_v7 = vmax.f32 %v440_v2, 0.0 }
  0xf8   : > { %v874_v5 = vpop.f32.mrf.mxu0  ;;  %899 = vmatmul.mubr.msk.f32.gmra.mxu1 %vm480_vm1, %v464_v1 }
  0xf9   : > { %v465_v6 = vmax.f32 %v435_v4, 0.0  ;;  %v450_v8 = vadd.f32 %v874_v5, %v755_v28 }
  0xfa   : > { %v444_v9 = vpop.f32.mrf.mxu0 }
  0xfb   : > { %v445_v10 = vadd.f32 %v755_v28, %v444_v9  ;;  %901 = vmatprep.mubr.msk.f32.mxu1 %vm480_vm1, %v465_v6  ;;  %v468_v12 = vmax.f32 %v450_v8, 0.0 }
  0xfc   : > { %902 = vmatmul.mubr.msk.f32.gmra.mxu1 %vm480_vm1, %v466_v7 }
  0xfd   : > { %v467_v11 = vmax.f32 %v445_v10, 0.0 }
  0xff   : > { %904 = vmatprep.mubr.msk.f32.mxu1 %vm480_vm1, %v467_v11 }
 0x100   : > { %905 = vmatmul.mubr.msk.f32.gmra.mxu1 %vm480_vm1, %v468_v12 }
 0x1a4   : > { %v885_v14 = vpop.f32.mrf.mxu1 }
 0x1a5   : > { %v601_v15 = vadd.f32 %v885_v14, %v772_v13 }
 0x1a6   : > { %v595_v16 = vpop.f32.mrf.mxu1 }
 0x1a7   : > { %675 = vst [vmem:[%s1066_s8 + $0x8] sm:$0xff] %v601_v15  ;;  %v596_v17 = vadd.f32 %v772_v13, %v595_v16 }
 0x1a8   : > { %v888_v18 = vpop.f32.mrf.mxu1 }
 0x1a9   : > { %674 = vst [vmem:[%s1066_s8] sm:$0xff] %v596_v17  ;;  %v611_v19 = vadd.f32 %v888_v18, %v772_v13 }
 0x1aa   : > { %v605_v20 = vpop.f32.mrf.mxu1 }
 0x1ab   : > { %677 = vst [vmem:[%s1066_s8 + $0x18] sm:$0xff] %v611_v19  ;;  %v606_v21 = vadd.f32 %v772_v13, %v605_v20 }
 0x1ac   : > { %v891_v22 = vpop.f32.mrf.mxu1 }
 0x1ad   : > { %676 = vst [vmem:[%s1066_s8 + $0x10] sm:$0xff] %v606_v21  ;;  %v621_v23 = vadd.f32 %v891_v22, %v772_v13 }
 0x1ae   : > { %v615_v24 = vpop.f32.mrf.mxu1 }
 0x1af   : > { %679 = vst [vmem:[%s1066_s8 + $0x28] sm:$0xff] %v621_v23  ;;  %v616_v25 = vadd.f32 %v772_v13, %v615_v24 }
 0x1b0   : > { %v894_v26 = vpop.f32.mrf.mxu1 }
 0x1b1   : > { %678 = vst [vmem:[%s1066_s8 + $0x20] sm:$0xff] %v616_v25  ;;  %v631_v27 = vadd.f32 %v894_v26, %v772_v13 }
 0x1b2   : > { %v625_v28 = vpop.f32.mrf.mxu1 }
 0x1b3   : > { %681 = vst [vmem:[%s1066_s8 + $0x38] sm:$0xff] %v631_v27  ;;  %v626_v29 = vadd.f32 %v772_v13, %v625_v28 }
 0x1b4   : > { %v897_v30 = vpop.f32.mrf.mxu1 }
 0x1b5   : > { %680 = vst [vmem:[%s1066_s8 + $0x30] sm:$0xff] %v626_v29  ;;  %v641_v31 = vadd.f32 %v897_v30, %v772_v13 }
 0x1b6   : > { %v635_v32 = vpop.f32.mrf.mxu1 }
 0x1b7   : > { %683 = vst [vmem:[%s1066_s8 + $0x48] sm:$0xff] %v641_v31  ;;  %v636_v33 = vadd.f32 %v772_v13, %v635_v32 }
 0x1b8   : > { %v900_v34 = vpop.f32.mrf.mxu1 }
 0x1b9   : > { %682 = vst [vmem:[%s1066_s8 + $0x40] sm:$0xff] %v636_v33  ;;  %v651_v35 = vadd.f32 %v900_v34, %v772_v13 }
 0x1ba   : > { %v645_v36 = vpop.f32.mrf.mxu1 }
 0x1bb   : > { %685 = vst [vmem:[%s1066_s8 + $0x58] sm:$0xff] %v651_v35  ;;  %v646_v37 = vadd.f32 %v772_v13, %v645_v36 }
 0x1bc   : > { %v903_v38 = vpop.f32.mrf.mxu1 }
 0x1bd   : > { %684 = vst [vmem:[%s1066_s8 + $0x50] sm:$0xff] %v646_v37  ;;  %v661_v39 = vadd.f32 %v903_v38, %v772_v13 }
 0x1be   : > { %v655_v40 = vpop.f32.mrf.mxu1 }
 0x1bf   : > { %687 = vst [vmem:[%s1066_s8 + $0x68] sm:$0xff] %v661_v39  ;;  %v656_v41 = vadd.f32 %v772_v13, %v655_v40 }
 0x1c0   : > { %v906_v42 = vpop.f32.mrf.mxu1 }
 0x1c1   : > { %686 = vst [vmem:[%s1066_s8 + $0x60] sm:$0xff] %v656_v41  ;;  %v671_v43 = vadd.f32 %v906_v42, %v772_v13 }
 0x1c2   : > { %v665_v44 = vpop.f32.mrf.mxu1 }
 0x1c3   : > { %689 = vst [vmem:[%s1066_s8 + $0x78] sm:$0xff] %v671_v43  ;;  %v666_v45 = vadd.f32 %v772_v13, %v665_v44 }
 0x1c5   : > { %688 = vst [vmem:[%s1066_s8 + $0x70] sm:$0xff] %v666_v45 }
 0x1c6 PF: > { %s15_s18 = sadd.s32 1, %s921_s18  }
 0x1c7   : > { %p12_p4 = scmp.ge.s32.totalorder %s15_s18, 4  }
 0x1c9   :  { %14 = sbr.rel (!%p12_p4) target bundleno = 1 (0x1), region = 70 }

</bundles_post_ra>
